<compile_context>
chip_gen: v7x
topology: tpu7x:2x2x1
jax: 0.10.0
libtpu: 0.0.40
codegen_flags: <defaults>
</compile_context>

<pallas_src>
import jax
import jax.numpy as jnp
from jax.experimental import pallas as pl
from jax.experimental.pallas import tpu as pltpu

NEG_SCALE = 5.893
KERNEL = 5
PADDING = 5
CIN = 4
COUT = 8
CIN_PAD = 8              # pad input channels to one sublane group (8)
NTAP = KERNEL * KERNEL   # 25


def _round_up(v, m):
    return ((v + m - 1) // m) * m


def _make_convt_where_kernel(wc, t_out_pad):
    """Per-batch fused (per-tap matmul accumulation + leaky-where) kernel.

    Kernel refs (leading size-1 batch dim squeezed by BlockSpec):
      x_ref : (CIN_PAD, T_in)         channel-padded, flat (h*Wc + w), zero-padded
      w_ref : (NTAP, COUT, CIN_PAD)   flipped/packed per-tap weight matrices
      o_ref : (COUT, t_out_pad)       flat lane-dense output, row-major (oh, Wc)
    """

    def kernel(x_ref, w_ref, o_ref):
        x = x_ref[...]                                      # (CIN_PAD, T_in)
        acc = jnp.zeros((COUT, t_out_pad), jnp.float32)
        # 25 small MXU matmuls accumulated in registers; no scratch traffic.
        for kh in range(KERNEL):
            for kw in range(KERNEL):
                tap = kh * KERNEL + kw
                d = kh * wc + kw                            # static lane shift
                acc = acc + jnp.dot(
                    w_ref[tap],                             # (COUT, CIN_PAD)
                    x[:, d:d + t_out_pad],                  # (CIN_PAD, t_out_pad)
                    preferred_element_type=jnp.float32)
        # Fused elementwise: where(y > 0, y, y * 5.893); unmasked 256-lane store.
        o_ref[...] = jnp.where(acc > 0, acc, acc * NEG_SCALE)

    return kernel


def conv_transpose_where(x_nchw, weight):
    """ConvTranspose2d(4->8, k=5, stride=1, padding=5, no bias) + where.

    x_nchw : (N, Cin, H, W)  float32
    weight : (Cin, Cout, KH, KW) float32  (PyTorch ConvTranspose2d layout)
    returns: (N, Cout, OH, OW) float32
    """
    N, Cin, H, W = x_nchw.shape
    Cin_w, Cout, KH, KW = weight.shape
    assert Cin == CIN and Cin_w == CIN and Cout == COUT
    assert KH == KERNEL and KW == KERNEL

    OH = (H - 1) + KERNEL - 2 * PADDING          # = H - 6
    OW = (W - 1) + KERNEL - 2 * PADDING          # = W - 6
    assert OH > 0 and OW > 0, "input spatial size too small for padding=5"

    crop = PADDING - (KERNEL - 1)                # = 1 (negative effective pad)
    Hc, Wc = H - 2 * crop, W - 2 * crop

    T_out = OH * Wc                              # valid flat outputs per batch
    T_out_pad = _round_up(T_out, 128)            # lane-dense output width
    d_max = (KERNEL - 1) * Wc + (KERNEL - 1)     # largest tap offset
    T_in = _round_up(max(Hc * Wc, T_out_pad + d_max), 128)

    # ---- light wrapper prep (no patch expansion, no layout transposes) ----
    x_crop = x_nchw[:, :, crop:H - crop, crop:W - crop]        # (N,Cin,Hc,Wc)
    x_flat = x_crop.reshape(N, Cin, Hc * Wc).astype(jnp.float32)
    x_flat = jnp.pad(x_flat,
                     ((0, 0), (0, CIN_PAD - Cin), (0, T_in - Hc * Wc)))

    # Per-tap weight matrices:
    #   w_packed[kh*KW+kw, oc, ic] = weight[ic, oc, KH-1-kh, KW-1-kw]
    w_flip = weight[:, :, ::-1, ::-1]                          # (Cin,Cout,KH,KW)
    w_packed = jnp.transpose(w_flip, (2, 3, 1, 0))             # (KH,KW,Cout,Cin)
    w_packed = w_packed.reshape(NTAP, Cout, Cin).astype(jnp.float32)
    w_packed = jnp.pad(w_packed, ((0, 0), (0, 0), (0, CIN_PAD - Cin)))

    kernel = _make_convt_where_kernel(Wc, T_out_pad)

    flops = 2 * N * NTAP * COUT * CIN_PAD * T_out_pad
    bytes_accessed = 4 * (x_flat.size + w_packed.size + N * COUT * T_out_pad)

    out_wide = pl.pallas_call(
        kernel,
        out_shape=jax.ShapeDtypeStruct((N, COUT, T_out_pad), jnp.float32),
        grid=(N,),
        in_specs=[
            pl.BlockSpec((None, CIN_PAD, T_in), lambda n: (n, 0, 0)),
            pl.BlockSpec((NTAP, COUT, CIN_PAD), lambda n: (0, 0, 0)),  # resident
        ],
        out_specs=pl.BlockSpec((None, COUT, T_out_pad), lambda n: (n, 0, 0)),
        compiler_params=pltpu.CompilerParams(
            dimension_semantics=("parallel",)),   # batch shards across 2 TCs on v7x
        cost_estimate=pl.CostEstimate(flops=flops, transcendentals=0,
                                      bytes_accessed=bytes_accessed),
    )(x_flat, w_packed)

    # Flat row-major (oh, Wc): crop pad + wrapped columns; already NCHW order.
    out = out_wide[:, :, :T_out].reshape(N, COUT, OH, Wc)[:, :, :, :OW]
    return out


def _reference(x_nchw, weight):
    """Pure-JAX reference of the PyTorch forward (scatter-add transposed conv)."""
    N, Cin, H, W = x_nchw.shape
    _, Cout, Kk, _ = weight.shape
    full = jnp.zeros((N, Cout, H + Kk - 1, W + Kk - 1), jnp.float32)
    for kh in range(Kk):
        for kw in range(Kk):
            contrib = jnp.einsum('nchw,co->nohw', x_nchw, weight[:, :, kh, kw])
            full = full.at[:, :, kh:kh + H, kw:kw + W].add(contrib)
    y1 = full[:, :, PADDING:-PADDING, PADDING:-PADDING]
    return jnp.where(y1 > 0, y1, y1 * NEG_SCALE)


if __name__ == "__main__":
    key = jax.random.PRNGKey(0)
    kx, kw = jax.random.split(key)

    # small shapes consistent with the module (valid for padding=5, k=5)
    x = jax.random.normal(kx, (2, 4, 16, 16), dtype=jnp.float32)
    # deterministic weight init, ConvTranspose2d layout (Cin, Cout, KH, KW)
    w = 0.1 * jax.random.normal(kw, (4, 8, 5, 5), dtype=jnp.float32)

    y = jax.block_until_ready(conv_transpose_where(x, w))
    y_ref = jax.block_until_ready(_reference(x, w))

    assert y.shape == (2, 8, 10, 10), y.shape
    assert jnp.allclose(y, y_ref, rtol=1e-4, atol=1e-4), "mismatch vs reference"

    print("KERNEL_OK")
</pallas_src>

<mosaic_0001>
module attributes {stable_mosaic.version = 11 : i64} {
  func.func @kernel(%arg0: i32, %arg1: memref<1x8x384xf32, #tpu.memory_space<vmem>>, %arg2: memref<25x8x8xf32, #tpu.memory_space<vmem>>, %arg3: memref<1x8x256xf32, #tpu.memory_space<vmem>>) attributes {dimension_semantics = [#tpu.dimension_semantics<parallel>], iteration_bounds = array<i64: 2>, scalar_prefetch = 0 : i64, scratch_operands = 0 : i64, tpu.core_type = #tpu.core_type<tc>, window_params = [{transform_indices = @transform_0, window_bounds = array<i64: 1, 8, 384>}, {pipeline_mode = #tpu.pipeline_mode<synchronous>, transform_indices = @transform_1, window_bounds = array<i64: 25, 8, 8>}, {transform_indices = @transform_2, window_bounds = array<i64: 1, 8, 256>}]} {
    %c0 = arith.constant 0 : index
    %c0_0 = arith.constant 0 : index
    %c0_1 = arith.constant 0 : index
    %0 = vector.load %arg1[%c0, %c0_0, %c0_1] : memref<1x8x384xf32, #tpu.memory_space<vmem>>, vector<1x8x384xf32>
    %1 = vector.shape_cast %0 : vector<1x8x384xf32> to vector<8x384xf32>
    %cst = arith.constant 0.000000e+00 : f32
    %2 = vector.broadcast %cst : f32 to vector<8x256xf32>
    %c0_2 = arith.constant 0 : index
    %c0_3 = arith.constant 0 : index
    %c0_4 = arith.constant 0 : index
    %3 = vector.load %arg2[%c0_2, %c0_3, %c0_4] : memref<25x8x8xf32, #tpu.memory_space<vmem>>, vector<1x8x8xf32>
    %4 = vector.shape_cast %3 : vector<1x8x8xf32> to vector<8x8xf32>
    %5 = vector.extract_strided_slice %1 {offsets = [0, 0], sizes = [8, 256], strides = [1, 1]} : vector<8x384xf32> to vector<8x256xf32>
    %cst_5 = arith.constant dense<0.000000e+00> : vector<8x256xf32>
    %6 = tpu.matmul %4, %5, %cst_5 {dimension_numbers = #tpu.dot_dimension_numbers<[1], [0], [0], [1], [0, 0, 1, 1], [], []>} : vector<8x8xf32>, vector<8x256xf32>, vector<8x256xf32> -> vector<8x256xf32>
    %7 = arith.addf %2, %6 : vector<8x256xf32>
    %c1 = arith.constant 1 : index
    %c0_6 = arith.constant 0 : index
    %c0_7 = arith.constant 0 : index
    %8 = vector.load %arg2[%c1, %c0_6, %c0_7] : memref<25x8x8xf32, #tpu.memory_space<vmem>>, vector<1x8x8xf32>
    %9 = vector.shape_cast %8 : vector<1x8x8xf32> to vector<8x8xf32>
    %10 = vector.extract_strided_slice %1 {offsets = [0, 1], sizes = [8, 256], strides = [1, 1]} : vector<8x384xf32> to vector<8x256xf32>
    %cst_8 = arith.constant dense<0.000000e+00> : vector<8x256xf32>
    %11 = tpu.matmul %9, %10, %cst_8 {dimension_numbers = #tpu.dot_dimension_numbers<[1], [0], [0], [1], [0, 0, 1, 1], [], []>} : vector<8x8xf32>, vector<8x256xf32>, vector<8x256xf32> -> vector<8x256xf32>
    %12 = arith.addf %7, %11 : vector<8x256xf32>
    %c2 = arith.constant 2 : index
    %c0_9 = arith.constant 0 : index
    %c0_10 = arith.constant 0 : index
    %13 = vector.load %arg2[%c2, %c0_9, %c0_10] : memref<25x8x8xf32, #tpu.memory_space<vmem>>, vector<1x8x8xf32>
    %14 = vector.shape_cast %13 : vector<1x8x8xf32> to vector<8x8xf32>
    %15 = vector.extract_strided_slice %1 {offsets = [0, 2], sizes = [8, 256], strides = [1, 1]} : vector<8x384xf32> to vector<8x256xf32>
    %cst_11 = arith.constant dense<0.000000e+00> : vector<8x256xf32>
    %16 = tpu.matmul %14, %15, %cst_11 {dimension_numbers = #tpu.dot_dimension_numbers<[1], [0], [0], [1], [0, 0, 1, 1], [], []>} : vector<8x8xf32>, vector<8x256xf32>, vector<8x256xf32> -> vector<8x256xf32>
    %17 = arith.addf %12, %16 : vector<8x256xf32>
    %c3 = arith.constant 3 : index
    %c0_12 = arith.constant 0 : index
    %c0_13 = arith.constant 0 : index
    %18 = vector.load %arg2[%c3, %c0_12, %c0_13] : memref<25x8x8xf32, #tpu.memory_space<vmem>>, vector<1x8x8xf32>
    %19 = vector.shape_cast %18 : vector<1x8x8xf32> to vector<8x8xf32>
    %20 = vector.extract_strided_slice %1 {offsets = [0, 3], sizes = [8, 256], strides = [1, 1]} : vector<8x384xf32> to vector<8x256xf32>
    %cst_14 = arith.constant dense<0.000000e+00> : vector<8x256xf32>
    %21 = tpu.matmul %19, %20, %cst_14 {dimension_numbers = #tpu.dot_dimension_numbers<[1], [0], [0], [1], [0, 0, 1, 1], [], []>} : vector<8x8xf32>, vector<8x256xf32>, vector<8x256xf32> -> vector<8x256xf32>
    %22 = arith.addf %17, %21 : vector<8x256xf32>
    %c4 = arith.constant 4 : index
    %c0_15 = arith.constant 0 : index
    %c0_16 = arith.constant 0 : index
    %23 = vector.load %arg2[%c4, %c0_15, %c0_16] : memref<25x8x8xf32, #tpu.memory_space<vmem>>, vector<1x8x8xf32>
    %24 = vector.shape_cast %23 : vector<1x8x8xf32> to vector<8x8xf32>
    %25 = vector.extract_strided_slice %1 {offsets = [0, 4], sizes = [8, 256], strides = [1, 1]} : vector<8x384xf32> to vector<8x256xf32>
    %cst_17 = arith.constant dense<0.000000e+00> : vector<8x256xf32>
    %26 = tpu.matmul %24, %25, %cst_17 {dimension_numbers = #tpu.dot_dimension_numbers<[1], [0], [0], [1], [0, 0, 1, 1], [], []>} : vector<8x8xf32>, vector<8x256xf32>, vector<8x256xf32> -> vector<8x256xf32>
    %27 = arith.addf %22, %26 : vector<8x256xf32>
    %c5 = arith.constant 5 : index
    %c0_18 = arith.constant 0 : index
    %c0_19 = arith.constant 0 : index
    %28 = vector.load %arg2[%c5, %c0_18, %c0_19] : memref<25x8x8xf32, #tpu.memory_space<vmem>>, vector<1x8x8xf32>
    %29 = vector.shape_cast %28 : vector<1x8x8xf32> to vector<8x8xf32>
    %30 = vector.extract_strided_slice %1 {offsets = [0, 14], sizes = [8, 256], strides = [1, 1]} : vector<8x384xf32> to vector<8x256xf32>
    %cst_20 = arith.constant dense<0.000000e+00> : vector<8x256xf32>
    %31 = tpu.matmul %29, %30, %cst_20 {dimension_numbers = #tpu.dot_dimension_numbers<[1], [0], [0], [1], [0, 0, 1, 1], [], []>} : vector<8x8xf32>, vector<8x256xf32>, vector<8x256xf32> -> vector<8x256xf32>
    %32 = arith.addf %27, %31 : vector<8x256xf32>
    %c6 = arith.constant 6 : index
    %c0_21 = arith.constant 0 : index
    %c0_22 = arith.constant 0 : index
    %33 = vector.load %arg2[%c6, %c0_21, %c0_22] : memref<25x8x8xf32, #tpu.memory_space<vmem>>, vector<1x8x8xf32>
    %34 = vector.shape_cast %33 : vector<1x8x8xf32> to vector<8x8xf32>
    %35 = vector.extract_strided_slice %1 {offsets = [0, 15], sizes = [8, 256], strides = [1, 1]} : vector<8x384xf32> to vector<8x256xf32>
    %cst_23 = arith.constant dense<0.000000e+00> : vector<8x256xf32>
    %36 = tpu.matmul %34, %35, %cst_23 {dimension_numbers = #tpu.dot_dimension_numbers<[1], [0], [0], [1], [0, 0, 1, 1], [], []>} : vector<8x8xf32>, vector<8x256xf32>, vector<8x256xf32> -> vector<8x256xf32>
    %37 = arith.addf %32, %36 : vector<8x256xf32>
    %c7 = arith.constant 7 : index
    %c0_24 = arith.constant 0 : index
    %c0_25 = arith.constant 0 : index
    %38 = vector.load %arg2[%c7, %c0_24, %c0_25] : memref<25x8x8xf32, #tpu.memory_space<vmem>>, vector<1x8x8xf32>
    %39 = vector.shape_cast %38 : vector<1x8x8xf32> to vector<8x8xf32>
    %40 = vector.extract_strided_slice %1 {offsets = [0, 16], sizes = [8, 256], strides = [1, 1]} : vector<8x384xf32> to vector<8x256xf32>
    %cst_26 = arith.constant dense<0.000000e+00> : vector<8x256xf32>
    %41 = tpu.matmul %39, %40, %cst_26 {dimension_numbers = #tpu.dot_dimension_numbers<[1], [0], [0], [1], [0, 0, 1, 1], [], []>} : vector<8x8xf32>, vector<8x256xf32>, vector<8x256xf32> -> vector<8x256xf32>
    %42 = arith.addf %37, %41 : vector<8x256xf32>
    %c8 = arith.constant 8 : index
    %c0_27 = arith.constant 0 : index
    %c0_28 = arith.constant 0 : index
    %43 = vector.load %arg2[%c8, %c0_27, %c0_28] : memref<25x8x8xf32, #tpu.memory_space<vmem>>, vector<1x8x8xf32>
    %44 = vector.shape_cast %43 : vector<1x8x8xf32> to vector<8x8xf32>
    %45 = vector.extract_strided_slice %1 {offsets = [0, 17], sizes = [8, 256], strides = [1, 1]} : vector<8x384xf32> to vector<8x256xf32>
    %cst_29 = arith.constant dense<0.000000e+00> : vector<8x256xf32>
    %46 = tpu.matmul %44, %45, %cst_29 {dimension_numbers = #tpu.dot_dimension_numbers<[1], [0], [0], [1], [0, 0, 1, 1], [], []>} : vector<8x8xf32>, vector<8x256xf32>, vector<8x256xf32> -> vector<8x256xf32>
    %47 = arith.addf %42, %46 : vector<8x256xf32>
    %c9 = arith.constant 9 : index
    %c0_30 = arith.constant 0 : index
    %c0_31 = arith.constant 0 : index
    %48 = vector.load %arg2[%c9, %c0_30, %c0_31] : memref<25x8x8xf32, #tpu.memory_space<vmem>>, vector<1x8x8xf32>
    %49 = vector.shape_cast %48 : vector<1x8x8xf32> to vector<8x8xf32>
    %50 = vector.extract_strided_slice %1 {offsets = [0, 18], sizes = [8, 256], strides = [1, 1]} : vector<8x384xf32> to vector<8x256xf32>
    %cst_32 = arith.constant dense<0.000000e+00> : vector<8x256xf32>
    %51 = tpu.matmul %49, %50, %cst_32 {dimension_numbers = #tpu.dot_dimension_numbers<[1], [0], [0], [1], [0, 0, 1, 1], [], []>} : vector<8x8xf32>, vector<8x256xf32>, vector<8x256xf32> -> vector<8x256xf32>
    %52 = arith.addf %47, %51 : vector<8x256xf32>
    %c10 = arith.constant 10 : index
    %c0_33 = arith.constant 0 : index
    %c0_34 = arith.constant 0 : index
    %53 = vector.load %arg2[%c10, %c0_33, %c0_34] : memref<25x8x8xf32, #tpu.memory_space<vmem>>, vector<1x8x8xf32>
    %54 = vector.shape_cast %53 : vector<1x8x8xf32> to vector<8x8xf32>
    %55 = vector.extract_strided_slice %1 {offsets = [0, 28], sizes = [8, 256], strides = [1, 1]} : vector<8x384xf32> to vector<8x256xf32>
    %cst_35 = arith.constant dense<0.000000e+00> : vector<8x256xf32>
    %56 = tpu.matmul %54, %55, %cst_35 {dimension_numbers = #tpu.dot_dimension_numbers<[1], [0], [0], [1], [0, 0, 1, 1], [], []>} : vector<8x8xf32>, vector<8x256xf32>, vector<8x256xf32> -> vector<8x256xf32>
    %57 = arith.addf %52, %56 : vector<8x256xf32>
    %c11 = arith.constant 11 : index
    %c0_36 = arith.constant 0 : index
    %c0_37 = arith.constant 0 : index
    %58 = vector.load %arg2[%c11, %c0_36, %c0_37] : memref<25x8x8xf32, #tpu.memory_space<vmem>>, vector<1x8x8xf32>
    %59 = vector.shape_cast %58 : vector<1x8x8xf32> to vector<8x8xf32>
    %60 = vector.extract_strided_slice %1 {offsets = [0, 29], sizes = [8, 256], strides = [1, 1]} : vector<8x384xf32> to vector<8x256xf32>
    %cst_38 = arith.constant dense<0.000000e+00> : vector<8x256xf32>
    %61 = tpu.matmul %59, %60, %cst_38 {dimension_numbers = #tpu.dot_dimension_numbers<[1], [0], [0], [1], [0, 0, 1, 1], [], []>} : vector<8x8xf32>, vector<8x256xf32>, vector<8x256xf32> -> vector<8x256xf32>
    %62 = arith.addf %57, %61 : vector<8x256xf32>
    %c12 = arith.constant 12 : index
    %c0_39 = arith.constant 0 : index
    %c0_40 = arith.constant 0 : index
    %63 = vector.load %arg2[%c12, %c0_39, %c0_40] : memref<25x8x8xf32, #tpu.memory_space<vmem>>, vector<1x8x8xf32>
    %64 = vector.shape_cast %63 : vector<1x8x8xf32> to vector<8x8xf32>
    %65 = vector.extract_strided_slice %1 {offsets = [0, 30], sizes = [8, 256], strides = [1, 1]} : vector<8x384xf32> to vector<8x256xf32>
    %cst_41 = arith.constant dense<0.000000e+00> : vector<8x256xf32>
    %66 = tpu.matmul %64, %65, %cst_41 {dimension_numbers = #tpu.dot_dimension_numbers<[1], [0], [0], [1], [0, 0, 1, 1], [], []>} : vector<8x8xf32>, vector<8x256xf32>, vector<8x256xf32> -> vector<8x256xf32>
    %67 = arith.addf %62, %66 : vector<8x256xf32>
    %c13 = arith.constant 13 : index
    %c0_42 = arith.constant 0 : index
    %c0_43 = arith.constant 0 : index
    %68 = vector.load %arg2[%c13, %c0_42, %c0_43] : memref<25x8x8xf32, #tpu.memory_space<vmem>>, vector<1x8x8xf32>
    %69 = vector.shape_cast %68 : vector<1x8x8xf32> to vector<8x8xf32>
    %70 = vector.extract_strided_slice %1 {offsets = [0, 31], sizes = [8, 256], strides = [1, 1]} : vector<8x384xf32> to vector<8x256xf32>
    %cst_44 = arith.constant dense<0.000000e+00> : vector<8x256xf32>
    %71 = tpu.matmul %69, %70, %cst_44 {dimension_numbers = #tpu.dot_dimension_numbers<[1], [0], [0], [1], [0, 0, 1, 1], [], []>} : vector<8x8xf32>, vector<8x256xf32>, vector<8x256xf32> -> vector<8x256xf32>
    %72 = arith.addf %67, %71 : vector<8x256xf32>
    %c14 = arith.constant 14 : index
    %c0_45 = arith.constant 0 : index
    %c0_46 = arith.constant 0 : index
    %73 = vector.load %arg2[%c14, %c0_45, %c0_46] : memref<25x8x8xf32, #tpu.memory_space<vmem>>, vector<1x8x8xf32>
    %74 = vector.shape_cast %73 : vector<1x8x8xf32> to vector<8x8xf32>
    %75 = vector.extract_strided_slice %1 {offsets = [0, 32], sizes = [8, 256], strides = [1, 1]} : vector<8x384xf32> to vector<8x256xf32>
    %cst_47 = arith.constant dense<0.000000e+00> : vector<8x256xf32>
    %76 = tpu.matmul %74, %75, %cst_47 {dimension_numbers = #tpu.dot_dimension_numbers<[1], [0], [0], [1], [0, 0, 1, 1], [], []>} : vector<8x8xf32>, vector<8x256xf32>, vector<8x256xf32> -> vector<8x256xf32>
    %77 = arith.addf %72, %76 : vector<8x256xf32>
    %c15 = arith.constant 15 : index
    %c0_48 = arith.constant 0 : index
    %c0_49 = arith.constant 0 : index
    %78 = vector.load %arg2[%c15, %c0_48, %c0_49] : memref<25x8x8xf32, #tpu.memory_space<vmem>>, vector<1x8x8xf32>
    %79 = vector.shape_cast %78 : vector<1x8x8xf32> to vector<8x8xf32>
    %80 = vector.extract_strided_slice %1 {offsets = [0, 42], sizes = [8, 256], strides = [1, 1]} : vector<8x384xf32> to vector<8x256xf32>
    %cst_50 = arith.constant dense<0.000000e+00> : vector<8x256xf32>
    %81 = tpu.matmul %79, %80, %cst_50 {dimension_numbers = #tpu.dot_dimension_numbers<[1], [0], [0], [1], [0, 0, 1, 1], [], []>} : vector<8x8xf32>, vector<8x256xf32>, vector<8x256xf32> -> vector<8x256xf32>
    %82 = arith.addf %77, %81 : vector<8x256xf32>
    %c16 = arith.constant 16 : index
    %c0_51 = arith.constant 0 : index
    %c0_52 = arith.constant 0 : index
    %83 = vector.load %arg2[%c16, %c0_51, %c0_52] : memref<25x8x8xf32, #tpu.memory_space<vmem>>, vector<1x8x8xf32>
    %84 = vector.shape_cast %83 : vector<1x8x8xf32> to vector<8x8xf32>
    %85 = vector.extract_strided_slice %1 {offsets = [0, 43], sizes = [8, 256], strides = [1, 1]} : vector<8x384xf32> to vector<8x256xf32>
    %cst_53 = arith.constant dense<0.000000e+00> : vector<8x256xf32>
    %86 = tpu.matmul %84, %85, %cst_53 {dimension_numbers = #tpu.dot_dimension_numbers<[1], [0], [0], [1], [0, 0, 1, 1], [], []>} : vector<8x8xf32>, vector<8x256xf32>, vector<8x256xf32> -> vector<8x256xf32>
    %87 = arith.addf %82, %86 : vector<8x256xf32>
    %c17 = arith.constant 17 : index
    %c0_54 = arith.constant 0 : index
    %c0_55 = arith.constant 0 : index
    %88 = vector.load %arg2[%c17, %c0_54, %c0_55] : memref<25x8x8xf32, #tpu.memory_space<vmem>>, vector<1x8x8xf32>
    %89 = vector.shape_cast %88 : vector<1x8x8xf32> to vector<8x8xf32>
    %90 = vector.extract_strided_slice %1 {offsets = [0, 44], sizes = [8, 256], strides = [1, 1]} : vector<8x384xf32> to vector<8x256xf32>
    %cst_56 = arith.constant dense<0.000000e+00> : vector<8x256xf32>
    %91 = tpu.matmul %89, %90, %cst_56 {dimension_numbers = #tpu.dot_dimension_numbers<[1], [0], [0], [1], [0, 0, 1, 1], [], []>} : vector<8x8xf32>, vector<8x256xf32>, vector<8x256xf32> -> vector<8x256xf32>
    %92 = arith.addf %87, %91 : vector<8x256xf32>
    %c18 = arith.constant 18 : index
    %c0_57 = arith.constant 0 : index
    %c0_58 = arith.constant 0 : index
    %93 = vector.load %arg2[%c18, %c0_57, %c0_58] : memref<25x8x8xf32, #tpu.memory_space<vmem>>, vector<1x8x8xf32>
    %94 = vector.shape_cast %93 : vector<1x8x8xf32> to vector<8x8xf32>
    %95 = vector.extract_strided_slice %1 {offsets = [0, 45], sizes = [8, 256], strides = [1, 1]} : vector<8x384xf32> to vector<8x256xf32>
    %cst_59 = arith.constant dense<0.000000e+00> : vector<8x256xf32>
    %96 = tpu.matmul %94, %95, %cst_59 {dimension_numbers = #tpu.dot_dimension_numbers<[1], [0], [0], [1], [0, 0, 1, 1], [], []>} : vector<8x8xf32>, vector<8x256xf32>, vector<8x256xf32> -> vector<8x256xf32>
    %97 = arith.addf %92, %96 : vector<8x256xf32>
    %c19 = arith.constant 19 : index
    %c0_60 = arith.constant 0 : index
    %c0_61 = arith.constant 0 : index
    %98 = vector.load %arg2[%c19, %c0_60, %c0_61] : memref<25x8x8xf32, #tpu.memory_space<vmem>>, vector<1x8x8xf32>
    %99 = vector.shape_cast %98 : vector<1x8x8xf32> to vector<8x8xf32>
    %100 = vector.extract_strided_slice %1 {offsets = [0, 46], sizes = [8, 256], strides = [1, 1]} : vector<8x384xf32> to vector<8x256xf32>
    %cst_62 = arith.constant dense<0.000000e+00> : vector<8x256xf32>
    %101 = tpu.matmul %99, %100, %cst_62 {dimension_numbers = #tpu.dot_dimension_numbers<[1], [0], [0], [1], [0, 0, 1, 1], [], []>} : vector<8x8xf32>, vector<8x256xf32>, vector<8x256xf32> -> vector<8x256xf32>
    %102 = arith.addf %97, %101 : vector<8x256xf32>
    %c20 = arith.constant 20 : index
    %c0_63 = arith.constant 0 : index
    %c0_64 = arith.constant 0 : index
    %103 = vector.load %arg2[%c20, %c0_63, %c0_64] : memref<25x8x8xf32, #tpu.memory_space<vmem>>, vector<1x8x8xf32>
    %104 = vector.shape_cast %103 : vector<1x8x8xf32> to vector<8x8xf32>
    %105 = vector.extract_strided_slice %1 {offsets = [0, 56], sizes = [8, 256], strides = [1, 1]} : vector<8x384xf32> to vector<8x256xf32>
    %cst_65 = arith.constant dense<0.000000e+00> : vector<8x256xf32>
    %106 = tpu.matmul %104, %105, %cst_65 {dimension_numbers = #tpu.dot_dimension_numbers<[1], [0], [0], [1], [0, 0, 1, 1], [], []>} : vector<8x8xf32>, vector<8x256xf32>, vector<8x256xf32> -> vector<8x256xf32>
    %107 = arith.addf %102, %106 : vector<8x256xf32>
    %c21 = arith.constant 21 : index
    %c0_66 = arith.constant 0 : index
    %c0_67 = arith.constant 0 : index
    %108 = vector.load %arg2[%c21, %c0_66, %c0_67] : memref<25x8x8xf32, #tpu.memory_space<vmem>>, vector<1x8x8xf32>
    %109 = vector.shape_cast %108 : vector<1x8x8xf32> to vector<8x8xf32>
    %110 = vector.extract_strided_slice %1 {offsets = [0, 57], sizes = [8, 256], strides = [1, 1]} : vector<8x384xf32> to vector<8x256xf32>
    %cst_68 = arith.constant dense<0.000000e+00> : vector<8x256xf32>
    %111 = tpu.matmul %109, %110, %cst_68 {dimension_numbers = #tpu.dot_dimension_numbers<[1], [0], [0], [1], [0, 0, 1, 1], [], []>} : vector<8x8xf32>, vector<8x256xf32>, vector<8x256xf32> -> vector<8x256xf32>
    %112 = arith.addf %107, %111 : vector<8x256xf32>
    %c22 = arith.constant 22 : index
    %c0_69 = arith.constant 0 : index
    %c0_70 = arith.constant 0 : index
    %113 = vector.load %arg2[%c22, %c0_69, %c0_70] : memref<25x8x8xf32, #tpu.memory_space<vmem>>, vector<1x8x8xf32>
    %114 = vector.shape_cast %113 : vector<1x8x8xf32> to vector<8x8xf32>
    %115 = vector.extract_strided_slice %1 {offsets = [0, 58], sizes = [8, 256], strides = [1, 1]} : vector<8x384xf32> to vector<8x256xf32>
    %cst_71 = arith.constant dense<0.000000e+00> : vector<8x256xf32>
    %116 = tpu.matmul %114, %115, %cst_71 {dimension_numbers = #tpu.dot_dimension_numbers<[1], [0], [0], [1], [0, 0, 1, 1], [], []>} : vector<8x8xf32>, vector<8x256xf32>, vector<8x256xf32> -> vector<8x256xf32>
    %117 = arith.addf %112, %116 : vector<8x256xf32>
    %c23 = arith.constant 23 : index
    %c0_72 = arith.constant 0 : index
    %c0_73 = arith.constant 0 : index
    %118 = vector.load %arg2[%c23, %c0_72, %c0_73] : memref<25x8x8xf32, #tpu.memory_space<vmem>>, vector<1x8x8xf32>
    %119 = vector.shape_cast %118 : vector<1x8x8xf32> to vector<8x8xf32>
    %120 = vector.extract_strided_slice %1 {offsets = [0, 59], sizes = [8, 256], strides = [1, 1]} : vector<8x384xf32> to vector<8x256xf32>
    %cst_74 = arith.constant dense<0.000000e+00> : vector<8x256xf32>
    %121 = tpu.matmul %119, %120, %cst_74 {dimension_numbers = #tpu.dot_dimension_numbers<[1], [0], [0], [1], [0, 0, 1, 1], [], []>} : vector<8x8xf32>, vector<8x256xf32>, vector<8x256xf32> -> vector<8x256xf32>
    %122 = arith.addf %117, %121 : vector<8x256xf32>
    %c24 = arith.constant 24 : index
    %c0_75 = arith.constant 0 : index
    %c0_76 = arith.constant 0 : index
    %123 = vector.load %arg2[%c24, %c0_75, %c0_76] : memref<25x8x8xf32, #tpu.memory_space<vmem>>, vector<1x8x8xf32>
    %124 = vector.shape_cast %123 : vector<1x8x8xf32> to vector<8x8xf32>
    %125 = vector.extract_strided_slice %1 {offsets = [0, 60], sizes = [8, 256], strides = [1, 1]} : vector<8x384xf32> to vector<8x256xf32>
    %cst_77 = arith.constant dense<0.000000e+00> : vector<8x256xf32>
    %126 = tpu.matmul %124, %125, %cst_77 {dimension_numbers = #tpu.dot_dimension_numbers<[1], [0], [0], [1], [0, 0, 1, 1], [], []>} : vector<8x8xf32>, vector<8x256xf32>, vector<8x256xf32> -> vector<8x256xf32>
    %127 = arith.addf %122, %126 : vector<8x256xf32>
    %cst_78 = arith.constant 0.000000e+00 : f32
    %128 = vector.broadcast %cst_78 : f32 to vector<8x256xf32>
    %129 = arith.cmpf ogt, %127, %128 : vector<8x256xf32>
    %cst_79 = arith.constant 5.893000e+00 : f32
    %130 = vector.broadcast %cst_79 : f32 to vector<8x256xf32>
    %131 = arith.mulf %127, %130 : vector<8x256xf32>
    %132 = arith.select %129, %127, %131 : vector<8x256xi1>, vector<8x256xf32>
    %c0_80 = arith.constant 0 : index
    %c0_81 = arith.constant 0 : index
    %c0_82 = arith.constant 0 : index
    %133 = vector.load %arg3[%c0_80, %c0_81, %c0_82] : memref<1x8x256xf32, #tpu.memory_space<vmem>>, vector<1x8x256xf32>
    %134 = vector.shape_cast %133 : vector<1x8x256xf32> to vector<8x256xf32>
    %135 = vector.shape_cast %132 : vector<8x256xf32> to vector<1x8x256xf32>
    tpu.vector_store %arg3[%c0_80, %c0_81, %c0_82], %135 {strides = array<i32>} : memref<1x8x256xf32, #tpu.memory_space<vmem>>, vector<1x8x256xf32>,
    return
  }
  func.func @transform_0(%arg0: i32) -> (i32, i32, i32) {
    %c0_i32 = arith.constant 0 : i32
    %c0_i32_0 = arith.constant 0 : i32
    %c0_i32_1 = arith.constant 0 : i32
    return %arg0, %c0_i32, %c0_i32_0 : i32, i32, i32
  }
  func.func @transform_1(%arg0: i32) -> (i32, i32, i32) {
    %c0_i32 = arith.constant 0 : i32
    %c0_i32_0 = arith.constant 0 : i32
    %c0_i32_1 = arith.constant 0 : i32
    %c0_i32_2 = arith.constant 0 : i32
    return %c0_i32, %c0_i32_0, %c0_i32_1 : i32, i32, i32
  }
  func.func @transform_2(%arg0: i32) -> (i32, i32, i32) {
    %c0_i32 = arith.constant 0 : i32
    %c0_i32_0 = arith.constant 0 : i32
    %c0_i32_1 = arith.constant 0 : i32
    return %arg0, %c0_i32, %c0_i32_0 : i32, i32, i32
  }
}

</mosaic_0001>

<bundles_post_ra>
// kernel: tpu_custom_call.1
= control target key start
LH: loop header
LB: loop body
LE: loop exit
PB: predicated region body
PF: predicated region fallthrough
CT: control target
= control target key end

     0   :  { %7 = vsyncpa [#allocation3], 0  ;;  %s3046_s0 = inlined_call_operand.vmem [shape: f32[2,8,384], index: 0, kind: input, shape index: {}]   ;;  %s3047_s1 = inlined_call_operand.vmem [shape: f32[25,8,8], index: 1, kind: input, shape index: {}]   ;;  %s3048_s2 = inlined_call_operand.hbm [shape: f32[2,8,256], index: 2, kind: output, shape index: {}]  }
   0x1   :  { %9 = vsyncpa [#allocation3 + $0x1], 0  ;;  %s2719_s9 = smov 0   ;;  %s2721_s10 = smov 0  }
   0x2   :  { %s2723_s11 = smov 0   ;;  %s2725_s12 = smov 0  }
   0x3 LB: > { %s2740_s13 = sadd.s32 4294967295, %s2676_s12   ;;  %s2440_s14 = sadd.s32 4294967294, %s2676_s12   ;;  %s2676_s12 = sphi %s2725_s12, %s3054_s12   ;;  %s2672_s11 = sphi %s2723_s11, %s3053_s11   ;;  %s2668_s10 = sphi %s2721_s10, %s3052_s10   ;;  %s2664_s9 = sphi %s2719_s9, %s3051_s9  }
   0x4   : > { %s2744_s15 = sadd.s32 1, %s2676_s12   ;;  %s69_s16 = sadd.s32 1, %s2672_s11 }
   0x5   : > { %s66_s17 = ssub.s32 %s2676_s12, %s2744_s15  ;;  %p79_p0 = scmp.ne.s32.totalorder %s2672_s11, %s2668_s10 }
   0x6   : > { %p67_p1 = scmp.eq.s32.totalorder %s66_s17, 0  ;;  %p80_p2 = scmp.eq.s32.totalorder %s2740_s13, 1 }
   0x7   : > { %p85_p3 = scmp.ne.s32.totalorder %s2668_s10, %s2664_s9  ;;  %p86_p4 = scmp.eq.s32.totalorder %s2440_s14, 1 }
   0x8   : > { %s2755_s18 = scalar_select %p67_p1, %s2672_s11, %s69_s16  }
   0x9   : > { %p2757_p5 = por %p80_p2, %p79_p0  ;;  %p2761_p6 = por %p86_p4, %p85_p3 }
   0xa   : > { %p2443_p7 = scmp.ge.s32.totalorder %s2676_s12, 1  ;;  %p115_p8 = scmp.lt.s32.totalorder %s2676_s12, 3 }
   0xc   : > { %p116_p9 = pnand %p2443_p7, %p115_p8 }
   0xd   : > { %p137_p10 = scmp.lt.s32.totalorder (!%p116_p9), %s2740_s13, 1  ;;  %v2678_v2 = vmov (!%p116_p9), 0.0   ;;  %s2679_s26 = smov (!%p116_p9), 98   ;;  %vm1209_vm0 = vcmask (!%p116_p9), 801792   ;;  %vm162_vm1 = vcmask (!%p116_p9), 64512   ;;  %v2469_v9 = vld [vmem:[%s3047_s1 + $0x60] sm:$0xff] (!%p116_p9) }
   0xe   : > { %119 = sbr.rel (%p116_p9) target bundleno = 517 (0x205), region = 28  ;;  %1281 = vmatprep.mubr.f32.mxu0 (!%p116_p9), %v2678_v2  ;;  %230 = vmatprep.mubr.f32.mxu1 (!%p116_p9), %v2678_v2  ;;  %s2680_s27 = smov (!%p116_p9), 127   ;;  %vm157_vm2 = vcmask (!%p116_p9), 1039360   ;;  %vm1298_vm3 = vcmask (!%p116_p9), 793600   ;;  %v2446_v18 = vld [vmem:[%s3047_s1 + $0x8] sm:$0xff] (!%p116_p9)  ;;  %vm1387_vm4 = vcmask (!%p116_p9), 785408  }
   0xf   : > { %s2681_s28 = smov (!%p116_p9), 97   ;;  %s2682_s29 = smov (!%p116_p9), 96   ;;  %v2471_v21 = vld [vmem:[%s3047_s1 + $0x68] sm:$0xff] (!%p116_p9)  ;;  %v145_v27 = vld [vmem:[%s3047_s1] sm:$0xff] (!%p116_p9)  ;;  %vm319_vm5 = vcmask (!%p116_p9), 1031168   ;;  %v2473_v30 = vld [vmem:[%s3047_s1 + $0x70] sm:$0xff] (!%p116_p9) }
  0x10   : > { %s2683_s30 = smov (!%p116_p9), 126   ;;  %s2684_s3 = smov (!%p116_p9), 86   ;;  %vm1476_vm6 = vcmask (!%p116_p9), 703488   ;;  %v2449_v37 = vld [vmem:[%s3047_s1 + $0x10] sm:$0xff] (!%p116_p9)  ;;  %v2475_v38 = vld [vmem:[%s3047_s1 + $0x78] sm:$0xff] (!%p116_p9)  ;;  %vm408_vm7 = vcmask (!%p116_p9), 1022976  }
  0x11   : > { %s2685_s4 = smov (!%p116_p9), 125   ;;  %s2686_s5 = smov (!%p116_p9), 85   ;;  %vm1565_vm8 = vcmask (!%p116_p9), 695296   ;;  %v2451_v49 = vld [vmem:[%s3047_s1 + $0x18] sm:$0xff] (!%p116_p9)  ;;  %v2477_v50 = vld [vmem:[%s3047_s1 + $0x80] sm:$0xff] (!%p116_p9)  ;;  %vm497_vm9 = vcmask (!%p116_p9), 1014784  }
  0x12   : > { %s2687_s6 = smov (!%p116_p9), 124   ;;  %s2688_s7 = smov (!%p116_p9), 84   ;;  %vm1654_vm10 = vcmask (!%p116_p9), 687104   ;;  %v2453_v61 = vld [vmem:[%s3047_s1 + $0x20] sm:$0xff] (!%p116_p9)  ;;  %v2479_v62 = vld [vmem:[%s3047_s1 + $0x88] sm:$0xff] (!%p116_p9)  ;;  %vm586_vm11 = vcmask (!%p116_p9), 932864  }
  0x13   : > { %s2689_s8 = smov (!%p116_p9), 114   ;;  %s2690_s14 = smov (!%p116_p9), 83   ;;  %vm1743_vm12 = vcmask (!%p116_p9), 678912   ;;  %vm675_vm13 = vcmask (!%p116_p9), 924672   ;;  %vm1832_vm14 = vcmask (!%p116_p9), 670720   ;;  %vm764_vm15 = vcmask (!%p116_p9), 916480  }
  0x14   : > { %s2691_s16 = smov (!%p116_p9), 113   ;;  %s2692_s17 = smov (!%p116_p9), 82  }
  0x15   : > { %s138_s21 = scalar_select %p137_p10, %s2740_s13, 1 }
  0x16   : > { %s2695_s23 = smov 111   ;;  %s2696_s24 = smov 71  }
  0x17   : > { %s2549_s22 = smul.u32 24, %s138_s21  ;;  %s2693_s21 = smov 112  }
  0x19   : > { %s141_s25 = scalar_lea.vmem %s3046_s0, %s2549_s22  ;;  %s2694_s22 = smov 72  }
  0x1a   : > { %v2772_v0 = vld [vmem:[%s141_s25 + $0x8] sm:$0xff]  ;;  %v2774_v1 = vld [vmem:[%s141_s25] sm:$0xff]  ;;  %v2780_v3 = vld [vmem:[%s141_s25 + $0x10] sm:$0xff]  ;;  %s2697_s25 = smov 110  }
  0x1b   : > { %1205 = vrot.lane.b32.xlu0 %v2772_v0, %s2679_s26  ;;  %1203 = vrot.lane.b32.xlu1 %v2774_v1, %s2679_s26 }
  0x1f   : > { %1207 = vrot.lane.b32.xlu0 %v2780_v3, %s2679_s26  ;;  %153 = vrot.lane.b32.xlu1 %v2772_v0, %s2680_s27  ;;  %s2698_s26 = smov 70  }
  0x23   : > { %155 = vrot.lane.b32.xlu0 %v2780_v3, %s2680_s27  ;;  %1294 = vrot.lane.b32.xlu1 %v2772_v0, %s2681_s28 }
  0x27   : > { %1296 = vrot.lane.b32.xlu0 %v2780_v3, %s2681_s28  ;;  %151 = vrot.lane.b32.xlu1 %v2774_v1, %s2680_s27 }
  0x2b   : > { %1292 = vrot.lane.b32.xlu0 %v2774_v1, %s2681_s28  ;;  %1383 = vrot.lane.b32.xlu1 %v2772_v0, %s2682_s29 }
  0x2f   : > { %1385 = vrot.lane.b32.xlu0 %v2780_v3, %s2682_s29  ;;  %1381 = vrot.lane.b32.xlu1 %v2774_v1, %s2682_s29  ;;  %s2699_s29 = smov 100  }
  0x33   : > { %315 = vrot.lane.b32.xlu0 %v2772_v0, %s2683_s30  ;;  %317 = vrot.lane.b32.xlu1 %v2780_v3, %s2683_s30 }
  0x37   : > { %1472 = vrot.lane.b32.xlu0 %v2772_v0, %s2684_s3  ;;  %1474 = vrot.lane.b32.xlu1 %v2780_v3, %s2684_s3 }
  0x3b   : > { %313 = vrot.lane.b32.xlu0 %v2774_v1, %s2683_s30  ;;  %1470 = vrot.lane.b32.xlu1 %v2774_v1, %s2684_s3  ;;  %s2700_s30 = smov 69  }
  0x3f   : > { %404 = vrot.lane.b32.xlu0 %v2772_v0, %s2685_s4  ;;  %406 = vrot.lane.b32.xlu1 %v2780_v3, %s2685_s4 }
  0x43   : > { %1561 = vrot.lane.b32.xlu0 %v2772_v0, %s2686_s5  ;;  %1563 = vrot.lane.b32.xlu1 %v2780_v3, %s2686_s5 }
  0x47   : > { %402 = vrot.lane.b32.xlu0 %v2774_v1, %s2685_s4  ;;  %1559 = vrot.lane.b32.xlu1 %v2774_v1, %s2686_s5  ;;  %s2703_s5 = smov [#allocation2]  }
  0x4b   : > { %493 = vrot.lane.b32.xlu0 %v2772_v0, %s2687_s6  ;;  %495 = vrot.lane.b32.xlu1 %v2780_v3, %s2687_s6 }
  0x4f   : > { %1650 = vrot.lane.b32.xlu0 %v2772_v0, %s2688_s7  ;;  %1652 = vrot.lane.b32.xlu1 %v2780_v3, %s2688_s7 }
  0x53   : > { %491 = vrot.lane.b32.xlu0 %v2774_v1, %s2687_s6  ;;  %1648 = vrot.lane.b32.xlu1 %v2774_v1, %s2688_s7  ;;  %s2701_s7 = smov 99   ;;  %s2618_s6 = sshll.u32 %s2703_s5, 4  ;;  %s2619_s6 = int_to_ptr.vmem [resolvable:$false] %s2618_s6 }
  0x57   : > { %582 = vrot.lane.b32.xlu0 %v2772_v0, %s2689_s8  ;;  %584 = vrot.lane.b32.xlu1 %v2780_v3, %s2689_s8 }
  0x5b   : > { %1739 = vrot.lane.b32.xlu0 %v2772_v0, %s2690_s14  ;;  %1741 = vrot.lane.b32.xlu1 %v2780_v3, %s2690_s14 }
  0x5f   : > { %580 = vrot.lane.b32.xlu0 %v2774_v1, %s2689_s8  ;;  %1737 = vrot.lane.b32.xlu1 %v2774_v1, %s2690_s14 }
  0x63   : > { %671 = vrot.lane.b32.xlu0 %v2772_v0, %s2691_s16  ;;  %673 = vrot.lane.b32.xlu1 %v2780_v3, %s2691_s16 }
  0x67   : > { %1828 = vrot.lane.b32.xlu0 %v2772_v0, %s2692_s17  ;;  %1830 = vrot.lane.b32.xlu1 %v2780_v3, %s2692_s17 }
  0x6b   : > { %669 = vrot.lane.b32.xlu0 %v2774_v1, %s2691_s16  ;;  %1826 = vrot.lane.b32.xlu1 %v2774_v1, %s2692_s17  ;;  %s2702_s16 = smov 68  }
  0x6f   : > { %760 = vrot.lane.b32.xlu0 %v2772_v0, %s2693_s21  ;;  %762 = vrot.lane.b32.xlu1 %v2780_v3, %s2693_s21 }
  0x73   : > { %1917 = vrot.lane.b32.xlu0 %v2772_v0, %s2694_s22  ;;  %1919 = vrot.lane.b32.xlu1 %v2780_v3, %s2694_s22 }
  0x77   : > { %758 = vrot.lane.b32.xlu0 %v2774_v1, %s2693_s21  ;;  %1915 = vrot.lane.b32.xlu1 %v2774_v1, %s2694_s22 }
  0x7b   : > { %849 = vrot.lane.b32.xlu0 %v2772_v0, %s2695_s23  ;;  %851 = vrot.lane.b32.xlu1 %v2780_v3, %s2695_s23 }
  0x7f   : > { %2006 = vrot.lane.b32.xlu0 %v2772_v0, %s2696_s24  ;;  %2008 = vrot.lane.b32.xlu1 %v2780_v3, %s2696_s24 }
  0x83   : > { %847 = vrot.lane.b32.xlu0 %v2774_v1, %s2695_s23  ;;  %2004 = vrot.lane.b32.xlu1 %v2774_v1, %s2696_s24  ;;  %s134_s24 = sand.u32 1, %s2668_s10  }
  0x87   : > { %938 = vrot.lane.b32.xlu0 %v2772_v0, %s2697_s25  ;;  %940 = vrot.lane.b32.xlu1 %v2780_v3, %s2697_s25 }
  0x8b   : > { %2095 = vrot.lane.b32.xlu0 %v2772_v0, %s2698_s26  ;;  %2097 = vrot.lane.b32.xlu1 %v2780_v3, %s2698_s26 }
  0x8d   : > { %v1206_v4 = vpop.permute.xlu0 %1205  ;;  %v1204_v5 = vpop.permute.xlu1 %1203 }
  0x8e   : > { %v1210_v10 = vsel %vm1209_vm0, %v1204_v5, %v1206_v4 }
  0x8f   : > { %936 = vrot.lane.b32.xlu0 %v2774_v1, %s2697_s25  ;;  %2093 = vrot.lane.b32.xlu1 %v2774_v1, %s2698_s26  ;;  %s2444_s25 = sshll.u32 %s134_s24, 4  ;;  %s2500_s26 = sshll.u32 %s2740_s13, 8 }
  0x90   : > { %s136_s27 = scalar_lea.vmem [#allocation2], %s2444_s25  ;;  %s3004_s3 = scalar_lea.hbm %s3048_s2, %s2500_s26 }
  0x91   : > { %v1208_v6 = vpop.permute.xlu0 %1207  ;;  %v154_v7 = vpop.permute.xlu1 %153  ;;  %s2381_s28 = sshll.u32 %s136_s27, 4  ;;  %s2367_s13 = scalar_lea.sflag [#allocation3], %s134_s24  ;;  %s3006_s28 = int_to_ptr.vmem [resolvable:$true] %s2381_s28 }
  0x92   : > { %v1211_v8 = vsel %vm1209_vm0, %v1206_v4, %v1208_v6  ;;  %vm1921_vm0 = vcmask 588800   ;;  %s2614_s4 = scalar_lea.vmem %s3006_s28, 256  ;;  %p2621_p0 = scmp.lt.s32.totalorder %s3006_s28, %s2619_s6 }
  0x93   : > { %1217 = vmatprep.subr.mxu0 %v1211_v8  ;;  %1027 = vrot.lane.b32.xlu0 %v2772_v0, %s2699_s29  ;;  %p2615_p11 = scmp.ne.s32.totalorder %s3006_s28, %s2614_s4 }
  0x94   : > { %1029 = vrot.lane.b32.xlu1 %v2780_v3, %s2699_s29  ;;  %1218 = vmatpush1.msra.mxu0 %v1210_v10  ;;  %v2455_v10 = vld [vmem:[%s3047_s1 + $0x28] sm:$0xff] }
  0x95   : > { %v156_v11 = vpop.permute.xlu0 %155  ;;  %v1295_v12 = vpop.permute.xlu1 %1294  ;;  %2470 = vmatmul.mubr.msk.f32.vlgmr.msra.gmra.mrb[0].mxu0 %vm162_vm1, %v2469_v9  ;;  %p2616_p12 = pnand %p2615_p11, %p2757_p5 }
  0x96   : > { %v159_v13 = vsel %vm157_vm2, %v154_v7, %v156_v11  ;;  %1370 = vmatprep.mubr.f32.mxu0 %v2678_v2  ;;  %v2481_v11 = vld [vmem:[%s3047_s1 + $0x90] sm:$0xff] }
  0x97   : > { %2184 = vrot.lane.b32.xlu0 %v2772_v0, %s2700_s30  ;;  %166 = vmatprep.subr.mxu1 %v159_v13  ;;  %p2617_p13 = pneg %p2616_p12 }
  0x98   : > { %2186 = vrot.lane.b32.xlu1 %v2780_v3, %s2700_s30 }
  0x99   : > { %v1297_v14 = vpop.permute.xlu0 %1296  ;;  %v152_v15 = vpop.permute.xlu1 %151 }
  0x9a   : > { %v158_v16 = vsel %vm157_vm2, %v152_v15, %v154_v7  ;;  %v1300_v17 = vsel %vm1298_vm3, %v1295_v12, %v1297_v14  ;;  %vm853_vm2 = vcmask 908288  }
  0x9b   : > { %1025 = vrot.lane.b32.xlu0 %v2774_v1, %s2699_s29  ;;  %167 = vmatpush1.msra.mxu1 %v158_v16 }
  0x9c   : > { %2182 = vrot.lane.b32.xlu1 %v2774_v1, %s2700_s30  ;;  %1306 = vmatprep.subr.mxu0 %v1300_v17 }
  0x9d   : > { %v1293_v19 = vpop.permute.xlu0 %1292  ;;  %v1384_v20 = vpop.permute.xlu1 %1383  ;;  %240 = vmatprep.subr.mxu1 %v2772_v0  ;;  %2447 = vmatmul.mubr.msk.f32.vlgmr.msra.gmra.mrb[0].mxu1 %vm162_vm1, %v2446_v18 }
  0x9e   : > { %v1299_v22 = vsel %vm1298_vm3, %v1293_v19, %v1295_v12  ;;  %241 = vmatpush1.msra.mxu1 %v2774_v1  ;;  %304 = vmatprep.mubr.f32.mxu1 %v2678_v2  ;;  %vm2010_vm3 = vcmask 580608  }
  0x9f   : > { %1116 = vrot.lane.b32.xlu0 %v2772_v0, %s2701_s7  ;;  %1307 = vmatpush1.msra.mxu0 %v1299_v22  ;;  %v2457_v22 = vld [vmem:[%s3047_s1 + $0x30] sm:$0xff] }
  0xa0   : > { %1118 = vrot.lane.b32.xlu1 %v2780_v3, %s2701_s7  ;;  %2472 = vmatmul.mubr.msk.f32.vlgmr.msra.gmra.mrb[0].mxu0 %vm162_vm1, %v2471_v21 }
  0xa1   : > { %v1386_v23 = vpop.permute.xlu0 %1385  ;;  %v1382_v24 = vpop.permute.xlu1 %1381  ;;  %1459 = vmatprep.mubr.f32.mxu0 %v2678_v2 }
  0xa2   : > { %v1388_v25 = vsel %vm1387_vm4, %v1382_v24, %v1384_v20  ;;  %v1389_v26 = vsel %vm1387_vm4, %v1384_v20, %v1386_v23  ;;  %v2483_v23 = vld [vmem:[%s3047_s1 + $0x98] sm:$0xff]  ;;  %vm942_vm4 = vcmask 900096  }
  0xa3   : > { %2273 = vrot.lane.b32.xlu0 %v2772_v0, %s2702_s16  ;;  %1395 = vmatprep.subr.mxu0 %v1389_v26 }
  0xa4   : > { %2275 = vrot.lane.b32.xlu1 %v2780_v3, %s2702_s16  ;;  %1396 = vmatpush1.msra.mxu0 %v1388_v25 }
  0xa5   : > { %v316_v28 = vpop.permute.xlu0 %315  ;;  %v318_v29 = vpop.permute.xlu1 %317  ;;  %2448 = vmatmul.mubr.msk.f32.vlgmr.msra.gmra.mrb[0].mxu1 %vm162_vm1, %v145_v27 }
  0xa6   : > { %v321_v31 = vsel %vm319_vm5, %v316_v28, %v318_v29  ;;  %391 = vmatprep.mubr.f32.mxu1 %v2678_v2 }
  0xa7   : > { %1114 = vrot.lane.b32.xlu0 %v2774_v1, %s2701_s7  ;;  %327 = vmatprep.subr.mxu1 %v321_v31  ;;  %s2620_s7 = scalar_lea.vmem %s2619_s6, 512 }
  0xa8   : > { %2271 = vrot.lane.b32.xlu1 %v2774_v1, %s2702_s16  ;;  %2474 = vmatmul.mubr.msk.f32.vlgmr.msra.gmra.mrb[0].mxu0 %vm162_vm1, %v2473_v30  ;;  %p2622_p1 = scmp.lt.s32.totalorder %s2620_s7, %s2614_s4 }
  0xa9   : > { %v1473_v32 = vpop.permute.xlu0 %1472  ;;  %v1475_v33 = vpop.permute.xlu1 %1474  ;;  %1548 = vmatprep.mubr.f32.mxu0 %v2678_v2 }
  0xaa   : > { %v1478_v34 = vsel %vm1476_vm6, %v1473_v32, %v1475_v33  ;;  %p2623_p2 = por %p2622_p1, %p2621_p0 }
  0xab   : > { %1484 = vmatprep.subr.mxu0 %v1478_v34  ;;  %v2459_v34 = vld [vmem:[%s3047_s1 + $0x38] sm:$0xff] }
  0xac   : > { %p2624_p3 = pnand %p2623_p2, %p2617_p13 }
  0xad   : > { %v314_v35 = vpop.permute.xlu0 %313  ;;  %v1471_v36 = vpop.permute.xlu1 %1470 }
  0xae   : > { %v320_v39 = vsel %vm319_vm5, %v314_v35, %v316_v28  ;;  %v1477_v40 = vsel %vm1476_vm6, %v1471_v36, %v1473_v32  ;;  %v2485_v35 = vld [vmem:[%s3047_s1 + $0xa0] sm:$0xff]  ;;  %vm2099_vm5 = vcmask 572416   ;;  %vm1031_vm6 = vcmask 818176  }
  0xaf   : > { %328 = vmatpush1.msra.mxu1 %v320_v39  ;;  %1485 = vmatpush1.msra.mxu0 %v1477_v40 }
  0xb0   : > { %2450 = vmatmul.mubr.msk.f32.vlgmr.msra.gmra.mrb[0].mxu1 %vm162_vm1, %v2449_v37  ;;  %2476 = vmatmul.mubr.msk.f32.vlgmr.msra.gmra.mrb[0].mxu0 %vm162_vm1, %v2475_v38 }
  0xb1   : > { %v405_v41 = vpop.permute.xlu0 %404  ;;  %v407_v42 = vpop.permute.xlu1 %406  ;;  %480 = vmatprep.mubr.f32.mxu1 %v2678_v2  ;;  %1637 = vmatprep.mubr.f32.mxu0 %v2678_v2 }
  0xb2   : > { %v410_v43 = vsel %vm408_vm7, %v405_v41, %v407_v42 }
  0xb3   : > { %416 = vmatprep.subr.mxu1 %v410_v43 }
  0xb5   : > { %v1562_v44 = vpop.permute.xlu0 %1561  ;;  %v1564_v45 = vpop.permute.xlu1 %1563 }
  0xb6   : > { %v1567_v46 = vsel %vm1565_vm8, %v1562_v44, %v1564_v45 }
  0xb7   : > { %1573 = vmatprep.subr.mxu0 %v1567_v46  ;;  %v2461_v46 = vld [vmem:[%s3047_s1 + $0x40] sm:$0xff] }
  0xb9   : > { %v403_v47 = vpop.permute.xlu0 %402  ;;  %v1560_v48 = vpop.permute.xlu1 %1559 }
  0xba   : > { %v409_v51 = vsel %vm408_vm7, %v403_v47, %v405_v41  ;;  %v1566_v52 = vsel %vm1565_vm8, %v1560_v48, %v1562_v44  ;;  %v2487_v47 = vld [vmem:[%s3047_s1 + $0xa8] sm:$0xff]  ;;  %vm2188_vm7 = vcmask 564224   ;;  %vm1120_vm8 = vcmask 809984  }
  0xbb   : > { %417 = vmatpush1.msra.mxu1 %v409_v51  ;;  %1574 = vmatpush1.msra.mxu0 %v1566_v52 }
  0xbc   : > { %2452 = vmatmul.mubr.msk.f32.vlgmr.msra.gmra.mrb[0].mxu1 %vm162_vm1, %v2451_v49  ;;  %2478 = vmatmul.mubr.msk.f32.vlgmr.msra.gmra.mrb[0].mxu0 %vm162_vm1, %v2477_v50 }
  0xbd   : > { %v494_v53 = vpop.permute.xlu0 %493  ;;  %v496_v54 = vpop.permute.xlu1 %495  ;;  %569 = vmatprep.mubr.f32.mxu1 %v2678_v2  ;;  %1726 = vmatprep.mubr.f32.mxu0 %v2678_v2 }
  0xbe   : > { %v499_v55 = vsel %vm497_vm9, %v494_v53, %v496_v54 }
  0xbf   : > { %505 = vmatprep.subr.mxu1 %v499_v55 }
  0xc1   : > { %v1651_v56 = vpop.permute.xlu0 %1650  ;;  %v1653_v57 = vpop.permute.xlu1 %1652 }
  0xc2   : > { %v1656_v58 = vsel %vm1654_vm10, %v1651_v56, %v1653_v57 }
  0xc3   : > { %1662 = vmatprep.subr.mxu0 %v1656_v58  ;;  %v2463_v58 = vld [vmem:[%s3047_s1 + $0x48] sm:$0xff] }
  0xc5   : > { %v492_v59 = vpop.permute.xlu0 %491  ;;  %v1649_v60 = vpop.permute.xlu1 %1648 }
  0xc6   : > { %v498_v63 = vsel %vm497_vm9, %v492_v59, %v494_v53  ;;  %v1655_v0 = vsel %vm1654_vm10, %v1649_v60, %v1651_v56  ;;  %v2489_v59 = vld [vmem:[%s3047_s1 + $0xb0] sm:$0xff]  ;;  %vm2277_vm9 = vcmask 556032  }
  0xc7   : > { %506 = vmatpush1.msra.mxu1 %v498_v63  ;;  %1663 = vmatpush1.msra.mxu0 %v1655_v0 }
  0xc8   : > { %2454 = vmatmul.mubr.msk.f32.vlgmr.msra.gmra.mrb[0].mxu1 %vm162_vm1, %v2453_v61  ;;  %2480 = vmatmul.mubr.msk.f32.vlgmr.msra.gmra.mrb[0].mxu0 %vm162_vm1, %v2479_v62 }
  0xc9   : > { %v583_v1 = vpop.permute.xlu0 %582  ;;  %v585_v3 = vpop.permute.xlu1 %584  ;;  %658 = vmatprep.mubr.f32.mxu1 %v2678_v2  ;;  %1815 = vmatprep.mubr.f32.mxu0 %v2678_v2 }
  0xca   : > { %v588_v4 = vsel %vm586_vm11, %v583_v1, %v585_v3 }
  0xcb   : > { %594 = vmatprep.subr.mxu1 %v588_v4 }
  0xcd   : > { %v1740_v5 = vpop.permute.xlu0 %1739  ;;  %v1742_v6 = vpop.permute.xlu1 %1741 }
  0xce   : > { %v1745_v7 = vsel %vm1743_vm12, %v1740_v5, %v1742_v6  ;;  %v2465_v6 = vld [vmem:[%s3047_s1 + $0x50] sm:$0xff] }
  0xcf   : > { %1751 = vmatprep.subr.mxu0 %v1745_v7 }
  0xd1   : > { %v581_v8 = vpop.permute.xlu0 %580  ;;  %v1738_v9 = vpop.permute.xlu1 %1737 }
  0xd2   : > { %v587_v12 = vsel %vm586_vm11, %v581_v8, %v583_v1  ;;  %v1744_v13 = vsel %vm1743_vm12, %v1738_v9, %v1740_v5  ;;  %v2491_v9 = vld [vmem:[%s3047_s1 + $0xb8] sm:$0xff] }
  0xd3   : > { %595 = vmatpush1.msra.mxu1 %v587_v12  ;;  %1752 = vmatpush1.msra.mxu0 %v1744_v13 }
  0xd4   : > { %2456 = vmatmul.mubr.msk.f32.vlgmr.msra.gmra.mrb[0].mxu1 %vm162_vm1, %v2455_v10  ;;  %2482 = vmatmul.mubr.msk.f32.vlgmr.msra.gmra.mrb[0].mxu0 %vm162_vm1, %v2481_v11 }
  0xd5   : > { %v672_v14 = vpop.permute.xlu0 %671  ;;  %v674_v15 = vpop.permute.xlu1 %673  ;;  %747 = vmatprep.mubr.f32.mxu1 %v2678_v2  ;;  %1904 = vmatprep.mubr.f32.mxu0 %v2678_v2 }
  0xd6   : > { %v677_v16 = vsel %vm675_vm13, %v672_v14, %v674_v15 }
  0xd7   : > { %683 = vmatprep.subr.mxu1 %v677_v16 }
  0xd9   : > { %v1829_v17 = vpop.permute.xlu0 %1828  ;;  %v1831_v18 = vpop.permute.xlu1 %1830 }
  0xda   : > { %v1834_v19 = vsel %vm1832_vm14, %v1829_v17, %v1831_v18  ;;  %v2467_v18 = vld [vmem:[%s3047_s1 + $0x58] sm:$0xff] }
  0xdb   : > { %1840 = vmatprep.subr.mxu0 %v1834_v19 }
  0xdd   : > { %v670_v20 = vpop.permute.xlu0 %669  ;;  %v1827_v21 = vpop.permute.xlu1 %1826 }
  0xde   : > { %v676_v24 = vsel %vm675_vm13, %v670_v20, %v672_v14  ;;  %v1833_v25 = vsel %vm1832_vm14, %v1827_v21, %v1829_v17 }
  0xdf   : > { %684 = vmatpush1.msra.mxu1 %v676_v24  ;;  %1841 = vmatpush1.msra.mxu0 %v1833_v25 }
  0xe0   : > { %2458 = vmatmul.mubr.msk.f32.vlgmr.msra.gmra.mrb[0].mxu1 %vm162_vm1, %v2457_v22  ;;  %2484 = vmatmul.mubr.msk.f32.vlgmr.msra.gmra.mrb[0].mxu0 %vm162_vm1, %v2483_v23 }
  0xe1   : > { %v761_v26 = vpop.permute.xlu0 %760  ;;  %v763_v27 = vpop.permute.xlu1 %762  ;;  %836 = vmatprep.mubr.f32.mxu1 %v2678_v2  ;;  %1993 = vmatprep.mubr.f32.mxu0 %v2678_v2 }
  0xe2   : > { %v766_v28 = vsel %vm764_vm15, %v761_v26, %v763_v27 }
  0xe3   : > { %772 = vmatprep.subr.mxu1 %v766_v28 }
  0xe5   : > { %v1918_v29 = vpop.permute.xlu0 %1917  ;;  %v1920_v30 = vpop.permute.xlu1 %1919 }
  0xe6   : > { %v1923_v31 = vsel %vm1921_vm0, %v1918_v29, %v1920_v30 }
  0xe7   : > { %1929 = vmatprep.subr.mxu0 %v1923_v31 }
  0xe9   : > { %v759_v32 = vpop.permute.xlu0 %758  ;;  %v1916_v33 = vpop.permute.xlu1 %1915 }
  0xea   : > { %v765_v36 = vsel %vm764_vm15, %v759_v32, %v761_v26  ;;  %v1922_v37 = vsel %vm1921_vm0, %v1916_v33, %v1918_v29 }
  0xeb   : > { %773 = vmatpush1.msra.mxu1 %v765_v36  ;;  %1930 = vmatpush1.msra.mxu0 %v1922_v37 }
  0xec   : > { %2460 = vmatmul.mubr.msk.f32.vlgmr.msra.gmra.mrb[0].mxu1 %vm162_vm1, %v2459_v34  ;;  %2486 = vmatmul.mubr.msk.f32.vlgmr.msra.gmra.mrb[0].mxu0 %vm162_vm1, %v2485_v35 }
  0xed   : > { %v850_v38 = vpop.permute.xlu0 %849  ;;  %v852_v39 = vpop.permute.xlu1 %851  ;;  %925 = vmatprep.mubr.f32.mxu1 %v2678_v2  ;;  %2082 = vmatprep.mubr.f32.mxu0 %v2678_v2 }
  0xee   : > { %v855_v40 = vsel %vm853_vm2, %v850_v38, %v852_v39 }
  0xef   : > { %861 = vmatprep.subr.mxu1 %v855_v40 }
  0xf1   : > { %v2007_v41 = vpop.permute.xlu0 %2006  ;;  %v2009_v42 = vpop.permute.xlu1 %2008 }
  0xf2   : > { %v2012_v43 = vsel %vm2010_vm3, %v2007_v41, %v2009_v42 }
  0xf3   : > { %2018 = vmatprep.subr.mxu0 %v2012_v43 }
  0xf5   : > { %v848_v44 = vpop.permute.xlu0 %847  ;;  %v2005_v45 = vpop.permute.xlu1 %2004 }
  0xf6   : > { %v854_v48 = vsel %vm853_vm2, %v848_v44, %v850_v38  ;;  %v2011_v49 = vsel %vm2010_vm3, %v2005_v45, %v2007_v41 }
  0xf7   : > { %862 = vmatpush1.msra.mxu1 %v854_v48  ;;  %2019 = vmatpush1.msra.mxu0 %v2011_v49 }
  0xf8   : > { %2462 = vmatmul.mubr.msk.f32.vlgmr.msra.gmra.mrb[0].mxu1 %vm162_vm1, %v2461_v46  ;;  %2488 = vmatmul.mubr.msk.f32.vlgmr.msra.gmra.mrb[0].mxu0 %vm162_vm1, %v2487_v47 }
  0xf9   : > { %v939_v50 = vpop.permute.xlu0 %938  ;;  %v941_v51 = vpop.permute.xlu1 %940  ;;  %1014 = vmatprep.mubr.f32.mxu1 %v2678_v2  ;;  %2171 = vmatprep.mubr.f32.mxu0 %v2678_v2 }
  0xfa   : > { %v944_v52 = vsel %vm942_vm4, %v939_v50, %v941_v51 }
  0xfb   : > { %950 = vmatprep.subr.mxu1 %v944_v52 }
  0xfd   : > { %v2096_v53 = vpop.permute.xlu0 %2095  ;;  %v2098_v54 = vpop.permute.xlu1 %2097 }
  0xfe   : > { %v2101_v55 = vsel %vm2099_vm5, %v2096_v53, %v2098_v54 }
  0xff   : > { %2107 = vmatprep.subr.mxu0 %v2101_v55 }
 0x101   : > { %v937_v56 = vpop.permute.xlu0 %936  ;;  %v2094_v57 = vpop.permute.xlu1 %2093 }
 0x102   : > { %v943_v60 = vsel %vm942_vm4, %v937_v56, %v939_v50  ;;  %v2100_v61 = vsel %vm2099_vm5, %v2094_v57, %v2096_v53 }
 0x103   : > { %951 = vmatpush1.msra.mxu1 %v943_v60  ;;  %2108 = vmatpush1.msra.mxu0 %v2100_v61 }
 0x104   : > { %2464 = vmatmul.mubr.msk.f32.vlgmr.msra.gmra.mrb[0].mxu1 %vm162_vm1, %v2463_v58  ;;  %2490 = vmatmul.mubr.msk.f32.vlgmr.msra.gmra.mrb[0].mxu0 %vm162_vm1, %v2489_v59 }
 0x105   : > { %v1028_v62 = vpop.permute.xlu0 %1027  ;;  %1103 = vmatprep.mubr.f32.mxu1 %v2678_v2  ;;  %2260 = vmatprep.mubr.f32.mxu0 %v2678_v2 }
 0x106   : > { %v1030_v63 = vpop.permute.xlu1 %1029 }
 0x107   : > { %v1033_v0 = vsel %vm1031_vm6, %v1028_v62, %v1030_v63 }
 0x108   : > { %1039 = vmatprep.subr.mxu1 %v1033_v0 }
 0x109   : > { %v2185_v1 = vpop.permute.xlu0 %2184 }
 0x10a   : > { %v2187_v3 = vpop.permute.xlu1 %2186 }
 0x10b   : > { %v2190_v4 = vsel %vm2188_vm7, %v2185_v1, %v2187_v3 }
 0x10c   : > { %2196 = vmatprep.subr.mxu0 %v2190_v4 }
 0x10d   : > { %v1026_v5 = vpop.permute.xlu0 %1025 }
 0x10e   : > { %v1032_v7 = vsel %vm1031_vm6, %v1026_v5, %v1028_v62  ;;  %v2183_v8 = vpop.permute.xlu1 %2182 }
 0x10f   : > { %v2189_v10 = vsel %vm2188_vm7, %v2183_v8, %v2185_v1  ;;  %1040 = vmatpush1.msra.mxu1 %v1032_v7 }
 0x110   : > { %2197 = vmatpush1.msra.mxu0 %v2189_v10  ;;  %2466 = vmatmul.mubr.msk.f32.vlgmr.msra.gmra.mrb[0].mxu1 %vm162_vm1, %v2465_v6 }
 0x111   : > { %v1117_v11 = vpop.permute.xlu0 %1116  ;;  %2492 = vmatmul.mubr.msk.f32.vlgmr.msra.gmra.mrb[0].mxu0 %vm162_vm1, %v2491_v9  ;;  %1192 = vmatprep.mubr.f32.mxu1 %v2678_v2 }
 0x112   : > { %v1119_v12 = vpop.permute.xlu1 %1118  ;;  %2349 = vmatprep.mubr.f32.mxu0 %v2678_v2  ;;  %v2493_v2 = vld [vmem:[%s3047_s1 + $0xc0] sm:$0xff] }
 0x113   : > { %v1122_v13 = vsel %vm1120_vm8, %v1117_v11, %v1119_v12 }
 0x114   : > { %1128 = vmatprep.subr.mxu1 %v1122_v13 }
 0x115   : > { %v2274_v14 = vpop.permute.xlu0 %2273 }
 0x116   : > { %v2276_v15 = vpop.permute.xlu1 %2275 }
 0x117   : > { %v2279_v16 = vsel %vm2277_vm9, %v2274_v14, %v2276_v15 }
 0x118   : > { %2285 = vmatprep.subr.mxu0 %v2279_v16 }
 0x119   : > { %v1115_v17 = vpop.permute.xlu0 %1114 }
 0x11a   : > { %v1121_v19 = vsel %vm1120_vm8, %v1115_v17, %v1117_v11  ;;  %v2272_v20 = vpop.permute.xlu1 %2271 }
 0x11b   : > { %v2278_v21 = vsel %vm2277_vm9, %v2272_v20, %v2274_v14  ;;  %1129 = vmatpush1.msra.mxu1 %v1121_v19 }
 0x11c   : > { %2286 = vmatpush1.msra.mxu0 %v2278_v21  ;;  %2468 = vmatmul.mubr.msk.f32.vlgmr.msra.gmra.mrb[0].mxu1 %vm162_vm1, %v2467_v18 }
 0x11d   : > { %2494 = vmatmul.mubr.msk.f32.vlgmr.msra.gmra.mrb[0].mxu0 %vm162_vm1, %v2493_v2 }
 0x1ef   : > { %v1194_v22 = vpop.f32.mrb[0].mxu1 }
 0x1f0   : > { %v2351_v23 = vpop.f32.mrb[0].mxu0  ;;  %v1196_v24 = vpop.f32.mrb[1].mxu1 }
 0x1f1   : > { %v2501_v25 = vadd.f32 %v2351_v23, %v1194_v22  ;;  %v2353_v26 = vpop.f32.mrb[1].mxu0 }
 0x1f2   : > { %v2502_v27 = vadd.f32 %v2353_v26, %v1196_v24 }
 0x1f3   : > { %vm2358_vm10 = vcmp.gt.f32.partialorder %v2501_v25, 0.0  ;;  %v2360_v28 = vmul.f32 5.893, %v2501_v25 }
 0x1f4   : > { %vm2359_vm11 = vcmp.gt.f32.partialorder %v2502_v27, 0.0  ;;  %v2361_v29 = vmul.f32 5.893, %v2502_v27 }
 0x1f5   : > { %v2362_v30 = vsel %vm2358_vm10, %v2501_v25, %v2360_v28 }
 0x1f6   : > { %v2363_v31 = vsel %vm2359_vm11, %v2502_v27, %v2361_v29  ;;  %2364 = vst [vmem:[%s136_s27] sm:$0xff] %v2362_v30 }
 0x1f7   : > { %2365 = vst [vmem:[%s136_s27 + $0x8] sm:$0xff] %v2363_v31 }
 0x1f8   : > { %2627 = shalt.err (!%p2624_p3)
}
 0x1f9   : > { %s2628_s8 = scalar_lea.hbm %s3004_s3, 256  ;;  %s2632_s17 = scalar_lea.hbm %s3048_s2, 512 }
 0x1fa   : > { %p2629_p4 = scmp.ne.s32.totalorder %s3004_s3, %s2628_s8  ;;  %p2633_p9 = scmp.lt.u32.totalorder %s3004_s3, %s3048_s2 }
 0x1fb   : > { %p2634_p10 = scmp.lt.u32.totalorder %s2632_s17, %s2628_s8  ;;  %p2636_p12 = scmp.lt.u32.totalorder %s2628_s8, %s3004_s3 }
 0x1fc   : > { %p2630_p7 = pnand %p2629_p4, %p2757_p5 }
 0x1fd   : > { %p2635_p11 = por %p2634_p10, %p2633_p9 }
 0x1fe   : > { %p2631_p8 = pneg %p2630_p7 }
 0x1ff   : > { %p2637_p13 = por %p2636_p12, %p2635_p11 }
 0x201   : > { %p2638_p0 = pnand %p2637_p13, %p2631_p8 }
 0x203   : > { %2641 = shalt.err (!%p2638_p0)
}
 0x204   : > { %2550 = dma.vmem_to_hbm [thread:$0]  (%p2757_p5), %s3006_s28, 256, %s3004_s3, %s2367_s13  }
 0x205 PF: > { %p2556_p1 = scmp.ge.s32.totalorder %s2676_s12, 2  ;;  %s2393_s23 = sand.u32 1, %s2664_s9  }
 0x206   : > { %s2394_s24 = scalar_lea.sflag [#allocation3], %s2393_s23 }
 0x207   : > { %p2553_p2 = pnand %p2556_p1, %p2761_p6 }
 0x209   : > { %2659 = dma.done.wait (!%p2553_p2), %s2394_s24, 256  }
 0x20a   : > { %2661 = vsyncadd (!%p2553_p2), %s2394_s24, 4294967040  ;;  %p12_p3 = scmp.ge.s32.totalorder %s2744_s15, 4   ;;  %s3051_s9 = smov %s2668_s10 }
 0x20b   : > { %s3052_s10 = smov %s2672_s11  ;;  %s3053_s11 = smov %s2755_s18 }
 0x20c   : > { %s3054_s12 = smov %s2744_s15  ;;  %14 = sbr.rel (!%p12_p3) target bundleno = 3 (0x3), region = 87 }
 0x213   :  { %2399 = vsyncpa [#allocation3], 1 }
 0x214   :  { %2401 = vsyncpa [#allocation3 + $0x1], 1 }

</bundles_post_ra>
